<compile_context>
chip_gen: v7x
topology: tpu7x:2x2x1
jax: 0.10.0
libtpu: 0.0.40
codegen_flags: <defaults>
</compile_context>

<pallas_src>
import functools

import jax
import jax.numpy as jnp
from jax.experimental import pallas as pl
from jax.experimental.pallas import tpu as pltpu


def _round_up(x, m):
    return ((x + m - 1) // m) * m


def _correction_kernel(scores_ref, weather_ref, yhat_ref, out_ref, ws_ref, *,
                       num_features, t_tile, scale):
    t = pl.program_id(1)
    bt, _, tt, tk = scores_ref.shape            # tt == t_tile, tk == full T

    # ---- weighted sum for this row tile -----------------------------------
    #   ws[b, r] = sum_f sum_k scores[b, f, r, k] * weather[b, f, k]
    # Dense f32 accumulation over features (VALU adds only), then a single
    # cross-lane reduce over the contraction axis (kept whole on the lane).
    acc = jnp.zeros((bt, tt, tk), jnp.float32)
    for f in range(num_features):                               # static -> unrolled
        s_f = scores_ref[:, f, :, :].astype(jnp.float32)        # (bt, Tt, T)
        w_f = weather_ref[:, f, :].astype(jnp.float32)          # (bt, T)
        acc = acc + s_f * w_f[:, None, :]
    ws_tile = jnp.sum(acc, axis=-1, keepdims=True)              # (bt, Tt, 1)

    row0 = pl.multiple_of(t * t_tile, t_tile)
    ws_ref[:, pl.ds(row0, t_tile), :] = ws_tile

    # ---- finalize on the last row tile: dot -> softmax over T -> correct --
    @pl.when(t == pl.num_programs(1) - 1)
    def _():
        yhat = yhat_ref[...].astype(jnp.float32)                # (bt, T, D)
        # weighted_sum is constant over D: sum_d(ws * yhat) == ws * sum_d(yhat)
        ysum = jnp.sum(yhat, axis=-1, keepdims=True)            # (bt, T, 1)
        dot = ws_ref[...] * ysum * (1.0 / scale)                # (bt, T, 1)
        m = jnp.max(dot, axis=1, keepdims=True)                 # softmax over T
        e = jnp.exp(dot - m)
        p = e / jnp.sum(e, axis=1, keepdims=True)               # exact divide
        out_ref[...] = (yhat + yhat * p).astype(out_ref.dtype)


def _chip_info():
    """(per-core VMEM bytes, TensorCores per chip), with conservative fallbacks."""
    vmem = 64 << 20                    # assume smallest (v7x per-TC) if unknown
    cores = 1
    try:
        vmem = int(getattr(pltpu.get_tpu_info(), "vmem_capacity_bytes", vmem))
    except Exception:
        pass
    try:
        kind = jax.devices()[0].device_kind.lower()
        if "v7" in kind:
            cores = 2
            vmem = min(vmem, 64 << 20)             # 64 MiB per TensorCore
        elif ("v4" in kind) or ("v5p" in kind):
            cores = 2                              # megacore
    except Exception:
        pass
    return vmem, cores


def _choose_tiles(B, F, T, s_item, scores_block_budget, n_cores):
    """Pick (batch tile bt, row tile tt) for the scores block (bt, F, tt, T).

    The lane (contraction) axis T is always kept whole so per-(b, f) DMA slabs
    stay contiguous; tt only needs to be a multiple of 8 (or equal T)."""

    def blk_bytes(bt, tt):
        return bt * F * _round_up(tt, 8) * _round_up(T, 128) * s_item

    # Row-tile candidates, largest first.
    tts = [T]
    c = (T // 8) * 8
    while c >= 8:
        if c < T and T % c == 0:
            tts.append(c)
        c -= 8

    bts = [b for b in range(B, 0, -1) if B % b == 0]   # largest first

    chosen = None
    for tt in tts:
        for bt in bts:
            if blk_bytes(bt, tt) <= scores_block_budget:
                chosen = (bt, tt)
                break
        if chosen is not None:
            break
    if chosen is None:              # nothing fits: smallest legal block, raise limit
        chosen = (1, tts[-1])
    bt, tt = chosen

    # v7x / megacore: the batch axis is "parallel" and sharded across the
    # TensorCores; keep an even number of batch grid steps so no core idles.
    if n_cores >= 2 and B >= 2 and (B // bt) % 2 != 0:
        for cand in bts:
            if cand <= bt and (B // cand) % 2 == 0:
                bt = cand
                break
    return int(bt), int(tt)


def _vmem_usage_bytes(bt, tt, F, T, D, s_item, w_item, y_item):
    """(8,128)-padded, double-buffered VMEM estimate for this kernel."""
    scores_blk = bt * F * _round_up(tt, 8) * _round_up(T, 128) * s_item
    weather_blk = bt * _round_up(F, 8) * _round_up(T, 128) * w_item
    yhat_blk = bt * _round_up(T, 8) * _round_up(D, 128) * y_item
    out_blk = yhat_blk
    ws_scratch = bt * _round_up(T, 8) * 128 * 4        # (bt, T, 1) f32, lane-padded
    return 2 * (scores_blk + weather_blk + yhat_blk + out_blk) + ws_scratch


def correction_mechanism(scores, weather_seq, y_hat, d_model):
    """scores: list of F arrays (B, T, T) or pre-stacked (B, F, T, T);
       weather_seq: (B, T, F); y_hat: (B, T, D).

       For bandwidth-bound deployments, pass scores pre-cast to bfloat16:
       the kernel upcasts to f32 internally, halving HBM traffic."""
    if isinstance(scores, (list, tuple)):
        scores = jnp.stack(scores, axis=1)              # (B, F, T, T)
    B, F, T, _ = scores.shape
    _, _, D = y_hat.shape
    scale = float(d_model) ** 0.5

    # Layout plumbing: weather as (B, F, T) so its lane axis matches the
    # scores contraction axis.
    weather_t = jnp.transpose(weather_seq, (0, 2, 1))

    s_item = jnp.dtype(scores.dtype).itemsize
    w_item = jnp.dtype(weather_t.dtype).itemsize
    y_item = jnp.dtype(y_hat.dtype).itemsize

    phys_vmem, n_cores = _chip_info()
    # ~24 MiB scores blocks on 128 MiB-VMEM parts (v5e/v6e), ~10 MiB on the
    # 64 MiB-per-TC v7x so double-buffering + the other blocks keep headroom.
    scores_budget = (24 << 20) if phys_vmem >= (96 << 20) else (10 << 20)

    bt, tt = _choose_tiles(B, F, T, s_item, scores_budget, n_cores)

    usage = _vmem_usage_bytes(bt, tt, F, T, D, s_item, w_item, y_item)
    cap = int(phys_vmem * 0.85)                  # headroom for compiler scratch
    vmem_limit = max(usage + (4 << 20), 16 << 20)
    vmem_limit = min(vmem_limit, cap)
    vmem_limit = int(min(max(vmem_limit, usage + (1 << 20)), phys_vmem))

    kernel = functools.partial(_correction_kernel, num_features=F, t_tile=tt,
                               scale=scale)

    cost = pl.CostEstimate(
        flops=2 * B * F * T * T + 3 * B * T * D + 6 * B * T,
        transcendentals=B * T,
        bytes_accessed=(scores.size * s_item + weather_t.size * w_item
                        + 2 * y_hat.size * y_item),
    )

    return pl.pallas_call(
        kernel,
        out_shape=jax.ShapeDtypeStruct((B, T, D), y_hat.dtype),
        grid_spec=pltpu.PrefetchScalarGridSpec(
            num_scalar_prefetch=0,
            grid=(B // bt, T // tt),
            in_specs=[
                # scores: row (sublane) axis tiled, contraction (lane) axis whole
                pl.BlockSpec((bt, F, tt, T), lambda b, t: (b, 0, t, 0)),
                # weather (B, F, T): resident across the row-tile axis
                pl.BlockSpec((bt, F, T), lambda b, t: (b, 0, 0)),
                # y_hat: resident across the row-tile axis, consumed at finalize
                pl.BlockSpec((bt, T, D), lambda b, t: (b, 0, 0)),
            ],
            # Lane-dense stores whenever d_model >= 128 (typical production).
            out_specs=pl.BlockSpec((bt, T, D), lambda b, t: (b, 0, 0)),
            scratch_shapes=[pltpu.VMEM((bt, T, 1), jnp.float32)],
        ),
        compiler_params=pltpu.CompilerParams(
            dimension_semantics=("parallel", "arbitrary"),
            vmem_limit_bytes=vmem_limit),
        cost_estimate=cost,
    )(scores, weather_t, y_hat)


def _reference(scores, weather_seq, y_hat, d_model):
    # Pure-JAX port of the PyTorch forward (VPU-only math, no MXU precision
    # surprises) for verification.
    if isinstance(scores, (list, tuple)):
        scores = jnp.stack(scores, axis=1)                       # (B, F, T, T)
    w = jnp.transpose(weather_seq, (0, 2, 1))                    # (B, F, T)
    ws = jnp.sum(scores * w[:, :, None, :], axis=(1, 3))[..., None]  # (B, T, 1)
    dot = jnp.sum(ws * y_hat, axis=-1, keepdims=True) / (float(d_model) ** 0.5)
    P = jax.nn.softmax(dot, axis=1)
    return y_hat + y_hat * P


if __name__ == "__main__":
    key = jax.random.PRNGKey(0)
    B, T, D, F = 4, 8, 32, 4          # batch, seq len, d_model, weather features
    k1, k2, k3 = jax.random.split(key, 3)
    # Mirror the PyTorch module interface: scores is a list of F (B, T, T) maps.
    scores_list = list(jax.random.normal(k1, (F, B, T, T), dtype=jnp.float32))
    weather_seq = jax.random.normal(k2, (B, T, F), dtype=jnp.float32)
    y_hat = jax.random.normal(k3, (B, T, D), dtype=jnp.float32)

    out = correction_mechanism(scores_list, weather_seq, y_hat, d_model=D)
    out = jax.block_until_ready(out)

    ref = _reference(scores_list, weather_seq, y_hat, D)
    assert out.shape == (B, T, D)
    assert jnp.allclose(out, ref, rtol=1e-5, atol=1e-5), "mismatch vs reference"
    print("KERNEL_OK")
</pallas_src>

<mosaic_0001>
module attributes {stable_mosaic.version = 11 : i64} {
  func.func @_correction_kernel(%arg0: i32, %arg1: i32, %arg2: memref<4x4x8x8xf32, #tpu.memory_space<vmem>>, %arg3: memref<4x4x8xf32, #tpu.memory_space<vmem>>, %arg4: memref<4x8x32xf32, #tpu.memory_space<vmem>>, %arg5: memref<4x8x32xf32, #tpu.memory_space<vmem>>, %arg6: memref<4x8x1xf32, #tpu.memory_space<vmem>>) attributes {dimension_semantics = [#tpu.dimension_semantics<parallel>, #tpu.dimension_semantics<arbitrary>], iteration_bounds = array<i64: 1, 1>, scalar_prefetch = 0 : i64, scratch_operands = 1 : i64, tpu.core_type = #tpu.core_type<tc>, window_params = [{transform_indices = @transform_0, window_bounds = array<i64: 4, 4, 8, 8>}, {transform_indices = @transform_1, window_bounds = array<i64: 4, 4, 8>}, {transform_indices = @transform_2, window_bounds = array<i64: 4, 8, 32>}, {transform_indices = @transform_3, window_bounds = array<i64: 4, 8, 32>}]} {
    %cst = arith.constant 0.000000e+00 : f32
    %0 = vector.broadcast %cst : f32 to vector<4x8x8xf32>
    %c0 = arith.constant 0 : index
    %c0_0 = arith.constant 0 : index
    %c0_1 = arith.constant 0 : index
    %c0_2 = arith.constant 0 : index
    %1 = vector.load %arg2[%c0, %c0_0, %c0_1, %c0_2] : memref<4x4x8x8xf32, #tpu.memory_space<vmem>>, vector<4x1x8x8xf32>
    %2 = vector.shape_cast %1 : vector<4x1x8x8xf32> to vector<4x8x8xf32>
    %c0_3 = arith.constant 0 : index
    %c0_4 = arith.constant 0 : index
    %c0_5 = arith.constant 0 : index
    %3 = vector.load %arg3[%c0_3, %c0_4, %c0_5] : memref<4x4x8xf32, #tpu.memory_space<vmem>>, vector<4x1x8xf32>
    %4 = vector.shape_cast %3 : vector<4x1x8xf32> to vector<4x8xf32>
    %5 = vector.shape_cast %4 : vector<4x8xf32> to vector<4x1x8xf32>
    %6 = vector.broadcast %5 : vector<4x1x8xf32> to vector<4x8x8xf32>
    %7 = arith.mulf %2, %6 : vector<4x8x8xf32>
    %8 = arith.addf %0, %7 : vector<4x8x8xf32>
    %c0_6 = arith.constant 0 : index
    %c1 = arith.constant 1 : index
    %c0_7 = arith.constant 0 : index
    %c0_8 = arith.constant 0 : index
    %9 = vector.load %arg2[%c0_6, %c1, %c0_7, %c0_8] : memref<4x4x8x8xf32, #tpu.memory_space<vmem>>, vector<4x1x8x8xf32>
    %10 = vector.shape_cast %9 : vector<4x1x8x8xf32> to vector<4x8x8xf32>
    %c0_9 = arith.constant 0 : index
    %c1_10 = arith.constant 1 : index
    %c0_11 = arith.constant 0 : index
    %11 = vector.load %arg3[%c0_9, %c1_10, %c0_11] : memref<4x4x8xf32, #tpu.memory_space<vmem>>, vector<4x1x8xf32>
    %12 = vector.shape_cast %11 : vector<4x1x8xf32> to vector<4x8xf32>
    %13 = vector.shape_cast %12 : vector<4x8xf32> to vector<4x1x8xf32>
    %14 = vector.broadcast %13 : vector<4x1x8xf32> to vector<4x8x8xf32>
    %15 = arith.mulf %10, %14 : vector<4x8x8xf32>
    %16 = arith.addf %8, %15 : vector<4x8x8xf32>
    %c0_12 = arith.constant 0 : index
    %c2 = arith.constant 2 : index
    %c0_13 = arith.constant 0 : index
    %c0_14 = arith.constant 0 : index
    %17 = vector.load %arg2[%c0_12, %c2, %c0_13, %c0_14] : memref<4x4x8x8xf32, #tpu.memory_space<vmem>>, vector<4x1x8x8xf32>
    %18 = vector.shape_cast %17 : vector<4x1x8x8xf32> to vector<4x8x8xf32>
    %c0_15 = arith.constant 0 : index
    %c2_16 = arith.constant 2 : index
    %c0_17 = arith.constant 0 : index
    %19 = vector.load %arg3[%c0_15, %c2_16, %c0_17] : memref<4x4x8xf32, #tpu.memory_space<vmem>>, vector<4x1x8xf32>
    %20 = vector.shape_cast %19 : vector<4x1x8xf32> to vector<4x8xf32>
    %21 = vector.shape_cast %20 : vector<4x8xf32> to vector<4x1x8xf32>
    %22 = vector.broadcast %21 : vector<4x1x8xf32> to vector<4x8x8xf32>
    %23 = arith.mulf %18, %22 : vector<4x8x8xf32>
    %24 = arith.addf %16, %23 : vector<4x8x8xf32>
    %c0_18 = arith.constant 0 : index
    %c3 = arith.constant 3 : index
    %c0_19 = arith.constant 0 : index
    %c0_20 = arith.constant 0 : index
    %25 = vector.load %arg2[%c0_18, %c3, %c0_19, %c0_20] : memref<4x4x8x8xf32, #tpu.memory_space<vmem>>, vector<4x1x8x8xf32>
    %26 = vector.shape_cast %25 : vector<4x1x8x8xf32> to vector<4x8x8xf32>
    %c0_21 = arith.constant 0 : index
    %c3_22 = arith.constant 3 : index
    %c0_23 = arith.constant 0 : index
    %27 = vector.load %arg3[%c0_21, %c3_22, %c0_23] : memref<4x4x8xf32, #tpu.memory_space<vmem>>, vector<4x1x8xf32>
    %28 = vector.shape_cast %27 : vector<4x1x8xf32> to vector<4x8xf32>
    %29 = vector.shape_cast %28 : vector<4x8xf32> to vector<4x1x8xf32>
    %30 = vector.broadcast %29 : vector<4x1x8xf32> to vector<4x8x8xf32>
    %31 = arith.mulf %26, %30 : vector<4x8x8xf32>
    %32 = arith.addf %24, %31 : vector<4x8x8xf32>
    %cst_24 = arith.constant dense<0.000000e+00> : vector<4x8xf32>
    %33 = vector.multi_reduction <add>, %32, %cst_24 [2] : vector<4x8x8xf32> to vector<4x8xf32>
    %34 = vector.shape_cast %33 : vector<4x8xf32> to vector<4x8x1xf32>
    %c8_i32 = arith.constant 8 : i32
    %35 = arith.muli %arg1, %c8_i32 : i32
    %36 = tpu.assume_multiple %35, 8 : i32
    %c0_25 = arith.constant 0 : index
    %37 = arith.index_cast %36 : i32 to index
    %c0_26 = arith.constant 0 : index
    %38 = vector.load %arg6[%c0_25, %37, %c0_26] : memref<4x8x1xf32, #tpu.memory_space<vmem>>, vector<4x8x1xf32>
    tpu.vector_store %arg6[%c0_25, %37, %c0_26], %34 {strides = array<i32>} : memref<4x8x1xf32, #tpu.memory_space<vmem>>, vector<4x8x1xf32>,
    %c0_i32 = arith.constant 0 : i32
    %39 = arith.cmpi eq, %arg1, %c0_i32 : i32
    %40 = arith.extui %39 : i1 to i32
    %c0_i32_27 = arith.constant 0 : i32
    %41 = arith.cmpi ne, %40, %c0_i32_27 : i32
    scf.if %41 {
      %c0_28 = arith.constant 0 : index
      %c0_29 = arith.constant 0 : index
      %c0_30 = arith.constant 0 : index
      %42 = vector.load %arg4[%c0_28, %c0_29, %c0_30] : memref<4x8x32xf32, #tpu.memory_space<vmem>>, vector<4x8x32xf32>
      %cst_31 = arith.constant dense<0.000000e+00> : vector<4x8xf32>
      %43 = vector.multi_reduction <add>, %42, %cst_31 [2] : vector<4x8x32xf32> to vector<4x8xf32>
      %44 = vector.shape_cast %43 : vector<4x8xf32> to vector<4x8x1xf32>
      %c0_32 = arith.constant 0 : index
      %c0_33 = arith.constant 0 : index
      %c0_34 = arith.constant 0 : index
      %45 = vector.load %arg6[%c0_32, %c0_33, %c0_34] : memref<4x8x1xf32, #tpu.memory_space<vmem>>, vector<4x8x1xf32>
      %46 = arith.mulf %45, %44 : vector<4x8x1xf32>
      %cst_35 = arith.constant 0.176776692 : f32
      %47 = vector.broadcast %cst_35 : f32 to vector<4x8x1xf32>
      %48 = arith.mulf %46, %47 : vector<4x8x1xf32>
      %cst_36 = arith.constant dense<0xFF800000> : vector<4x1xf32>
      %49 = vector.multi_reduction <maximumf>, %48, %cst_36 [1] : vector<4x8x1xf32> to vector<4x1xf32>
      %50 = vector.shape_cast %49 : vector<4x1xf32> to vector<4x1x1xf32>
      %51 = vector.broadcast %50 : vector<4x1x1xf32> to vector<4x8x1xf32>
      %52 = arith.subf %48, %51 : vector<4x8x1xf32>
      %53 = math.exp %52 : vector<4x8x1xf32>
      %cst_37 = arith.constant dense<0.000000e+00> : vector<4x1xf32>
      %54 = vector.multi_reduction <add>, %53, %cst_37 [1] : vector<4x8x1xf32> to vector<4x1xf32>
      %55 = vector.shape_cast %54 : vector<4x1xf32> to vector<4x1x1xf32>
      %56 = vector.broadcast %55 : vector<4x1x1xf32> to vector<4x8x1xf32>
      %57 = arith.divf %53, %56 : vector<4x8x1xf32>
      %58 = vector.broadcast %57 : vector<4x8x1xf32> to vector<4x8x32xf32>
      %59 = arith.mulf %42, %58 : vector<4x8x32xf32>
      %60 = arith.addf %42, %59 : vector<4x8x32xf32>
      %c0_38 = arith.constant 0 : index
      %c0_39 = arith.constant 0 : index
      %c0_40 = arith.constant 0 : index
      %61 = vector.load %arg5[%c0_38, %c0_39, %c0_40] : memref<4x8x32xf32, #tpu.memory_space<vmem>>, vector<4x8x32xf32>
      tpu.vector_store %arg5[%c0_38, %c0_39, %c0_40], %60 {strides = array<i32>} : memref<4x8x32xf32, #tpu.memory_space<vmem>>, vector<4x8x32xf32>,
    } else {
    }
    return
  }
  func.func @transform_0(%arg0: i32, %arg1: i32) -> (i32, i32, i32, i32) {
    %c0_i32 = arith.constant 0 : i32
    %c0_i32_0 = arith.constant 0 : i32
    %c0_i32_1 = arith.constant 0 : i32
    return %arg0, %c0_i32, %arg1, %c0_i32_0 : i32, i32, i32, i32
  }
  func.func @transform_1(%arg0: i32, %arg1: i32) -> (i32, i32, i32) {
    %c0_i32 = arith.constant 0 : i32
    %c0_i32_0 = arith.constant 0 : i32
    %c0_i32_1 = arith.constant 0 : i32
    return %arg0, %c0_i32, %c0_i32_0 : i32, i32, i32
  }
  func.func @transform_2(%arg0: i32, %arg1: i32) -> (i32, i32, i32) {
    %c0_i32 = arith.constant 0 : i32
    %c0_i32_0 = arith.constant 0 : i32
    %c0_i32_1 = arith.constant 0 : i32
    return %arg0, %c0_i32, %c0_i32_0 : i32, i32, i32
  }
  func.func @transform_3(%arg0: i32, %arg1: i32) -> (i32, i32, i32) {
    %c0_i32 = arith.constant 0 : i32
    %c0_i32_0 = arith.constant 0 : i32
    %c0_i32_1 = arith.constant 0 : i32
    return %arg0, %c0_i32, %c0_i32_0 : i32, i32, i32
  }
}

</mosaic_0001>

<bundles_post_ra>
// kernel: tpu_custom_call.1
= control target key start
LH: loop header
LB: loop body
LE: loop exit
PB: predicated region body
PF: predicated region fallthrough
CT: control target
= control target key end

     0   :  { %8 = vsyncpa [#allocation4], 0  ;;  %s633_s0 = inlined_call_operand.hbm [shape: f32[4,4,8,8], index: 0, kind: input, shape index: {}]   ;;  %s634_s1 = inlined_call_operand.hbm [shape: f32[4,4,8], index: 1, kind: input, shape index: {}]   ;;  %s635_s2 = inlined_call_operand.hbm [shape: f32[4,8,32], index: 2, kind: input, shape index: {}]   ;;  %s636_s3 = inlined_call_operand.hbm [shape: f32[4,8,32], index: 3, kind: output, shape index: {}]  }
   0x1   :  { %9 = vsyncpa [#allocation7], 0 }
   0x2   :  { %10 = vsyncpa [#allocation5], 0  ;;  %s503_s12 = smov [#allocation6]   ;;  %s409_s16 = scalar_lea.hbm %s634_s1, 256 }
   0x3   :  { %s28_s13 = sshll.u32 %s503_s12, 4  ;;  %p410_p0 = scmp.ne.s32.totalorder %s634_s1, %s409_s16  ;;  %s29_s13 = int_to_ptr.vmem [resolvable:$true] %s28_s13 }
   0x4   :  { %p413_p1 = scmp.lt.u32.totalorder %s409_s16, %s634_s1 }
   0x6   :  { %p415_p2 = pnand %p413_p1, %p410_p0 }
   0x8   :  { %418 = shalt.err (!%p415_p2)
}
   0x9   :  { %s419_s21 = scalar_lea.vmem %s29_s13, 256  ;;  %p424_p4 = scmp.lt.s32.totalorder %s29_s13, %s29_s13 }
   0xa   :  { %p420_p3 = scmp.ne.s32.totalorder %s29_s13, %s419_s21  ;;  %p425_p5 = scmp.lt.s32.totalorder %s419_s21, %s419_s21 }
   0xc   :  { %p426_p6 = por %p425_p5, %p424_p4 }
   0xe   :  { %p427_p7 = pnand %p426_p6, %p420_p3 }
  0x10   :  { %430 = shalt.err (!%p427_p7)
}
  0x11   :  { %s504_s22 = smov 64   ;;  %s505_s23 = smov 4  }
  0x12   :  { %34 = dma.hbm_to_vmem [thread:$0]  %s634_s1, 256, %s29_s13, [#allocation7], %s504_s22, %s504_s22, %s505_s23  }
  0x13   :  { %s506_s26 = smov [#allocation3]   ;;  %s431_s30 = scalar_lea.hbm %s633_s0, 2048 }
  0x14   :  { %s16_s27 = sshll.u32 %s506_s26, 4  ;;  %p432_p8 = scmp.ne.s32.totalorder %s633_s0, %s431_s30  ;;  %s17_s27 = int_to_ptr.vmem [resolvable:$true] %s16_s27 }
  0x15   :  { %p435_p9 = scmp.lt.u32.totalorder %s431_s30, %s633_s0 }
  0x17   :  { %p437_p10 = pnand %p435_p9, %p432_p8 }
  0x19   :  { %440 = shalt.err (!%p437_p10)
}
  0x1a   :  { %s441_s8 = scalar_lea.vmem %s17_s27, 2048  ;;  %p446_p12 = scmp.lt.s32.totalorder %s17_s27, %s17_s27 }
  0x1b   :  { %p442_p11 = scmp.ne.s32.totalorder %s17_s27, %s441_s8  ;;  %p447_p13 = scmp.lt.s32.totalorder %s441_s8, %s441_s8 }
  0x1d   :  { %p448_p0 = por %p447_p13, %p446_p12 }
  0x1f   :  { %p449_p1 = pnand %p448_p0, %p442_p11 }
  0x21   :  { %452 = shalt.err (!%p449_p1)
}
  0x22   :  { %s507_s1 = smov 128   ;;  %s508_s9 = smov 8  }
  0x23   :  { %22 = dma.hbm_to_vmem [thread:$0]  %s633_s0, 2048, %s17_s27, [#allocation4], %s507_s1, %s507_s1, %s508_s9  }
  0x24   :  { %s509_s12 = smov [#allocation8]   ;;  %s453_s16 = scalar_lea.hbm %s635_s2, 512 }
  0x25   :  { %s40_s13 = sshll.u32 %s509_s12, 4  ;;  %p454_p2 = scmp.ne.s32.totalorder %s635_s2, %s453_s16  ;;  %s41_s13 = int_to_ptr.vmem [resolvable:$true] %s40_s13 }
  0x26   :  { %p457_p3 = scmp.lt.u32.totalorder %s453_s16, %s635_s2 }
  0x28   :  { %p459_p4 = pnand %p457_p3, %p454_p2 }
  0x2a   :  { %462 = shalt.err (!%p459_p4)
}
  0x2b   :  { %s463_s21 = scalar_lea.vmem %s41_s13, 512  ;;  %p468_p6 = scmp.lt.s32.totalorder %s41_s13, %s41_s13 }
  0x2c   :  { %p464_p5 = scmp.ne.s32.totalorder %s41_s13, %s463_s21  ;;  %p469_p7 = scmp.lt.s32.totalorder %s463_s21, %s463_s21 }
  0x2e   :  { %p470_p8 = por %p469_p7, %p468_p6 }
  0x30   :  { %p471_p9 = pnand %p470_p8, %p464_p5 }
  0x32   :  { %474 = shalt.err (!%p471_p9)
}
  0x33   :  { %46 = dma.hbm_to_vmem [thread:$0]  %s635_s2, 512, %s41_s13, [#allocation7], %s507_s1, %s507_s1, %s508_s9  }
  0x34   :  { %497 = dma.done.wait [#allocation4], 2048  }
  0x35   :  { %498 = vsyncadd [#allocation4], 4294965248 }
  0x36   :  { %499 = dma.done.wait [#allocation7], 768  }
  0x37   :  { %500 = vsyncadd [#allocation7], 4294966528  ;;  %v58_v0 = vld [vmem:[#allocation3 + $0x40] sm:$0xff]  ;;  %v368_v1 = vld [vmem:[#allocation6 + $0x8] ss:$0 sm:$0xff]  ;;  %vm187_vm0 = vcmask 64512  }
  0x38   :  { %v91_v2 = vld [vmem:[#allocation3 + $0x48] sm:$0xff]  ;;  %v82_v3 = vmul.f32 %v368_v1, %v58_v0  ;;  %v124_v5 = vld [vmem:[#allocation3 + $0x50] sm:$0xff]  ;;  %v157_v9 = vld [vmem:[#allocation3 + $0x58] sm:$0xff]  ;;  %vm215_vm1 = vcmask 261120   ;;  %vm202_vm2 = vcmask 7168   ;;  %s511_s2 = smov [#allocation9]  }
  0x39   :  { %v372_v4 = vld [vmem:[#allocation6 + $0x9] ss:$0 sm:$0xff]  ;;  %v376_v6 = vld [vmem:[#allocation6 + $0xa] ss:$0 sm:$0xff]  ;;  %v380_v10 = vld [vmem:[#allocation6 + $0xb] ss:$0 sm:$0xff] }
  0x3a   :  { %v115_v7 = vmul.f32 %v372_v4, %v91_v2  ;;  %v148_v8 = vmul.f32 %v376_v6, %v124_v5  ;;  %v56_v11 = vld [vmem:[#allocation3] sm:$0xff]  ;;  %v89_v13 = vld [vmem:[#allocation3 + $0x8] sm:$0xff]  ;;  %v181_v16 = vmul.f32 %v380_v10, %v157_v9  ;;  %v122_v19 = vld [vmem:[#allocation3 + $0x10] sm:$0xff]  ;;  %s353_s23 = sshll.u32 %s511_s2, 4  ;;  %s354_s23 = int_to_ptr.vmem [resolvable:$true] %s353_s23 }
  0x3b   :  { %v366_v12 = vld [vmem:[#allocation6] ss:$0 sm:$0xff]  ;;  %v370_v14 = vld [vmem:[#allocation6 + $0x1] ss:$0 sm:$0xff]  ;;  %v374_v20 = vld [vmem:[#allocation6 + $0x2] ss:$0 sm:$0xff]  ;;  %p480_p11 = scmp.lt.s32.totalorder %s354_s23, %s354_s23 }
  0x3c   :  { %v119_v15 = vadd.f32 %v115_v7, %v82_v3  ;;  %v80_v17 = vmul.f32 %v366_v12, %v56_v11  ;;  %v113_v18 = vmul.f32 %v370_v14, %v89_v13  ;;  %v155_v21 = vld [vmem:[#allocation3 + $0x18] sm:$0xff]  ;;  %v146_v22 = vmul.f32 %v374_v20, %v122_v19  ;;  %v378_v23 = vld [vmem:[#allocation6 + $0x3] ss:$0 sm:$0xff]  ;;  %v369_v25 = vld [vmem:[#allocation6 + $0xc] ss:$0 sm:$0xff]  ;;  %s475_s24 = scalar_lea.vmem %s354_s23, 512 }
  0x3d   :  { %v59_v24 = vld [vmem:[#allocation3 + $0x60] sm:$0xff]  ;;  %v179_v28 = vmul.f32 %v378_v23, %v155_v21  ;;  %v92_v30 = vld [vmem:[#allocation3 + $0x68] sm:$0xff]  ;;  %v125_v32 = vld [vmem:[#allocation3 + $0x70] sm:$0xff]  ;;  %p476_p10 = scmp.ne.s32.totalorder %s354_s23, %s475_s24  ;;  %p481_p12 = scmp.lt.s32.totalorder %s475_s24, %s475_s24 }
  0x3e   :  { %v152_v26 = vadd.f32 %v148_v8, %v119_v15  ;;  %v117_v27 = vadd.f32 %v113_v18, %v80_v17  ;;  %v83_v29 = vmul.f32 %v369_v25, %v59_v24  ;;  %v373_v31 = vld [vmem:[#allocation6 + $0xd] ss:$0 sm:$0xff]  ;;  %v377_v34 = vld [vmem:[#allocation6 + $0xe] ss:$0 sm:$0xff]  ;;  %v158_v35 = vld [vmem:[#allocation3 + $0x78] sm:$0xff]  ;;  %v510_v8 = vmov 0  }
  0x3f   :  { %v116_v33 = vmul.f32 %v373_v31, %v92_v30  ;;  %v381_v36 = vld [vmem:[#allocation6 + $0xf] ss:$0 sm:$0xff]  ;;  %v149_v39 = vmul.f32 %v377_v34, %v125_v32  ;;  %v57_v40 = vld [vmem:[#allocation3 + $0x20] sm:$0xff]  ;;  %v123_v47 = vld [vmem:[#allocation3 + $0x30] sm:$0xff]  ;;  %391 = vset.pattern.permute.xlu0 %v510_v8  ;;  %392 = vset.pattern.permute.xlu1 %v510_v8  ;;  %p482_p13 = por %p481_p12, %p480_p11 }
  0x40   :  { %v185_v37 = vadd.f32 %v181_v16, %v152_v26  ;;  %v150_v38 = vadd.f32 %v146_v22, %v117_v27  ;;  %v367_v41 = vld [vmem:[#allocation6 + $0x4] ss:$0 sm:$0xff]  ;;  %v90_v42 = vld [vmem:[#allocation3 + $0x28] sm:$0xff]  ;;  %v182_v44 = vmul.f32 %v381_v36, %v158_v35  ;;  %v371_v46 = vld [vmem:[#allocation6 + $0x5] ss:$0 sm:$0xff] }
  0x41   :  { %v120_v43 = vadd.f32 %v116_v33, %v83_v29  ;;  %v81_v45 = vmul.f32 %v367_v41, %v57_v40  ;;  %v375_v48 = vld [vmem:[#allocation6 + $0x6] ss:$0 sm:$0xff]  ;;  %v114_v51 = vmul.f32 %v371_v46, %v90_v42  ;;  %v156_v53 = vld [vmem:[#allocation3 + $0x38] sm:$0xff]  ;;  %v379_v54 = vld [vmem:[#allocation6 + $0x7] ss:$0 sm:$0xff]  ;;  %p483_p0 = pnand %p482_p13, %p476_p10 }
  0x42   :  { %v194_v49 = vsel %vm187_vm0, %v185_v37, 0.0  ;;  %v183_v50 = vadd.f32 %v179_v28, %v150_v38  ;;  %v147_v52 = vmul.f32 %v375_v48, %v123_v47  ;;  %v180_v58 = vmul.f32 %v379_v54, %v156_v53  ;;  %v576_v61 = vld [vmem:[#allocation8 + $0x8] sm:$0xff]  ;;  %v581_v1 = vld [vmem:[#allocation8] sm:$0xff]  ;;  %v584_v3 = vld [vmem:[#allocation8 + $0x18] sm:$0xff] }
  0x43   :  { %195 = vadd.xlane.f32.xlu1 %v194_v49  ;;  %v153_v55 = vadd.f32 %v149_v39, %v120_v43  ;;  %v118_v57 = vadd.f32 %v114_v51, %v81_v45  ;;  %v219_v0 = vsel %vm215_vm1, %v576_v61, 0.0  ;;  %v216_v4 = vsel %vm215_vm1, %v581_v1, 0.0  ;;  %v590_v6 = vld [vmem:[#allocation8 + $0x10] sm:$0xff] }
  0x44   :  { %v188_v56 = vsel %vm187_vm0, %v183_v50, 0.0  ;;  %v225_v5 = vsel %vm215_vm1, %v584_v3, 0.0  ;;  %v222_v7 = vsel %vm215_vm1, %v590_v6, 0.0 }
  0x45   :  { %189 = vadd.xlane.f32.xlu0 %v188_v56  ;;  %v186_v59 = vadd.f32 %v182_v44, %v153_v55  ;;  %v151_v60 = vadd.f32 %v147_v52, %v118_v57 }
  0x47   :  { %v197_v62 = vsel %vm187_vm0, %v186_v59, 0.0  ;;  %v184_v63 = vadd.f32 %v180_v58, %v151_v60 }
  0x48   :  { %198 = vadd.xlane.f32.xlu1 %v197_v62 }
  0x49   :  { %v191_v2 = vsel %vm187_vm0, %v184_v63, 0.0 }
  0x4a   :  { %192 = vadd.xlane.f32.xlu0 %v191_v2 }
  0x4c   :  { %220 = vadd.xlane.f32.xlu1 %v219_v0 }
  0x4e   :  { %217 = vadd.xlane.f32.xlu0 %v216_v4 }
  0x50   :  { %226 = vadd.xlane.f32.xlu1 %v225_v5 }
  0x52   :  { %223 = vadd.xlane.f32.xlu0 %v222_v7 }
  0xd0   :  { %v196_v9 = vpop.xlane.xlu1 %195 }
  0xd1   :  { %205 = vst.msk [vmem:[#allocation2 + $0x10] sm:$0xff] %vm202_vm2, %v196_v9 }
  0xd2   :  { %v190_v10 = vpop.xlane.xlu0 %189 }
  0xd3   :  { %203 = vst.msk [vmem:[#allocation2] sm:$0xff] %vm202_vm2, %v190_v10 }
  0xd5   :  { %v199_v11 = vpop.xlane.xlu1 %198 }
  0xd6   :  { %206 = vst.msk [vmem:[#allocation2 + $0x18] sm:$0xff] %vm202_vm2, %v199_v11 }
  0xd7   :  { %v193_v12 = vpop.xlane.xlu0 %192 }
  0xd8   :  { %204 = vst.msk [vmem:[#allocation2 + $0x8] sm:$0xff] %vm202_vm2, %v193_v12  ;;  %v230_v20 = vld [vmem:[#allocation2 + $0x10] sm:$0xff] }
  0xd9   :  { %v221_v13 = vpop.xlane.xlu1 %220 }
  0xda   :  { %v228_v14 = vld [vmem:[#allocation2] sm:$0xff] }
  0xdb   :  { %v218_v15 = vpop.xlane.xlu0 %217 }
  0xdc   :  { %v232_v16 = vmul.f32 %v228_v14, %v218_v15 }
  0xdd   :  { %v231_v17 = vld [vmem:[#allocation2 + $0x18] sm:$0xff]  ;;  %v227_v18 = vpop.xlane.xlu1 %226 }
  0xde   :  { %v235_v19 = vmul.f32 %v231_v17, %v227_v18  ;;  %v236_v21 = vmul.f32 0.17677669, %v232_v16 }
  0xdf   :  { %v229_v22 = vld [vmem:[#allocation2 + $0x8] sm:$0xff]  ;;  %v224_v24 = vpop.xlane.xlu0 %223 }
  0xe0   :  { %v239_v23 = vmul.f32 0.17677669, %v235_v19  ;;  %v233_v25 = vmul.f32 %v229_v22, %v221_v13  ;;  %v240_v26 = vsel %vm202_vm2, %v236_v21, -inf  ;;  %v234_v27 = vmul.f32 %v230_v20, %v224_v24 }
  0xe1   :  { %v241_v28 = vrot.slane %v240_v26, 4 }
  0xe2   :  { %v261_v29 = vsel %vm202_vm2, %v239_v23, -inf  ;;  %v237_v30 = vmul.f32 0.17677669, %v233_v25  ;;  %v238_v32 = vmul.f32 0.17677669, %v234_v27 }
  0xe3   :  { %v262_v31 = vrot.slane %v261_v29, 4  ;;  %v242_v33 = vmax.f32 %v240_v26, %v241_v28 }
  0xe4   :  { %v247_v34 = vsel %vm202_vm2, %v237_v30, -inf  ;;  %v254_v36 = vsel %vm202_vm2, %v238_v32, -inf }
  0xe5   :  { %v263_v35 = vmax.f32 %v261_v29, %v262_v31  ;;  %v248_v37 = vrot.slane %v247_v34, 4  ;;  %v243_v38 = vrot.slane %v242_v33, 2  ;;  %v255_v39 = vrot.slane %v254_v36, 4 }
  0xe7   :  { %v264_v40 = vrot.slane %v263_v35, 2  ;;  %v249_v41 = vmax.f32 %v247_v34, %v248_v37  ;;  %v244_v42 = vmax.f32 %v242_v33, %v243_v38  ;;  %v256_v43 = vmax.f32 %v254_v36, %v255_v39 }
  0xe9   :  { %v265_v44 = vmax.f32 %v263_v35, %v264_v40  ;;  %v250_v45 = vrot.slane %v249_v41, 2  ;;  %v245_v46 = vrot.slane %v244_v42, 1  ;;  %v257_v47 = vrot.slane %v256_v43, 2 }
  0xeb   :  { %v266_v48 = vrot.slane %v265_v44, 1  ;;  %v251_v49 = vmax.f32 %v249_v41, %v250_v45  ;;  %v246_v50 = vmax.f32 %v244_v42, %v245_v46  ;;  %v258_v51 = vmax.f32 %v256_v43, %v257_v47 }
  0xed   :  { %v267_v52 = vmax.f32 %v265_v44, %v266_v48  ;;  %v252_v53 = vrot.slane %v251_v49, 1  ;;  %v268_v54 = vsub.f32 %v236_v21, %v246_v50  ;;  %v259_v55 = vrot.slane %v258_v51, 1 }
  0xef   :  { %v271_v56 = vsub.f32 %v239_v23, %v267_v52  ;;  %v253_v57 = vmax.f32 %v251_v49, %v252_v53  ;;  %v272_v58 = vmul.f32 1.442695, %v268_v54  ;;  %v260_v59 = vmax.f32 %v258_v51, %v259_v55 }
  0xf1   :  { %v278_v60 = vmul.f32 1.442695, %v271_v56  ;;  %v269_v62 = vsub.f32 %v237_v30, %v253_v57  ;;  %393 = vpow2.f32 %v272_v58  ;;  %v270_v63 = vsub.f32 %v238_v32, %v260_v59 }
  0xf3   :  { %395 = vpow2.f32 %v278_v60  ;;  %v274_v0 = vmul.f32 1.442695, %v269_v62  ;;  %v276_v2 = vmul.f32 1.442695, %v270_v63 }
  0xf5   :  { %397 = vpow2.f32 %v274_v0 }
  0xf6   :  { %399 = vpow2.f32 %v276_v2 }
  0xfb   :  { %v394_v4 = vpop.eup %393 }
  0xfc   :  { %v280_v7 = vsel %vm202_vm2, %v394_v4, 0.0 }
  0xfd   :  { %v396_v5 = vpop.eup %395  ;;  %v281_v8 = vrot.slane %v280_v7, 4 }
  0xfe   :  { %v301_v9 = vsel %vm202_vm2, %v396_v5, 0.0 }
  0xff   :  { %v302_v10 = vrot.slane %v301_v9, 4  ;;  %v398_v11 = vpop.eup %397  ;;  %v282_v12 = vadd.f32 %v281_v8, %v280_v7 }
 0x100   :  { %v400_v13 = vpop.eup %399  ;;  %v287_v14 = vsel %vm202_vm2, %v398_v11, 0.0 }
 0x101   :  { %v303_v15 = vadd.f32 %v302_v10, %v301_v9  ;;  %v288_v16 = vrot.slane %v287_v14, 4  ;;  %v283_v17 = vrot.slane %v282_v12, 2  ;;  %v294_v18 = vsel %vm202_vm2, %v400_v13, 0.0 }
 0x102   :  { %v295_v19 = vrot.slane %v294_v18, 4 }
 0x103   :  { %v289_v20 = vadd.f32 %v288_v16, %v287_v14  ;;  %v304_v21 = vrot.slane %v303_v15, 2  ;;  %v284_v22 = vadd.f32 %v283_v17, %v282_v12 }
 0x104   :  { %v296_v23 = vadd.f32 %v295_v19, %v294_v18 }
 0x105   :  { %v290_v24 = vrot.slane %v289_v20, 2  ;;  %v285_v25 = vrot.slane %v284_v22, 1  ;;  %v305_v29 = vadd.f32 %v304_v21, %v303_v15 }
 0x106   :  { %v297_v26 = vrot.slane %v296_v23, 2 }
 0x107   :  { %v286_v27 = vadd.f32 %v285_v25, %v284_v22  ;;  %v291_v28 = vadd.f32 %v290_v24, %v289_v20  ;;  %v306_v34 = vrot.slane %v305_v29, 1 }
 0x108   :  { %v298_v30 = vadd.f32 %v297_v26, %v296_v23 }
 0x109   :  { %401 = vrcp.f32 %v286_v27  ;;  %v292_v31 = vrot.slane %v291_v28, 1  ;;  %v307_v36 = vadd.f32 %v306_v34, %v305_v29 }
 0x10a   :  { %v299_v32 = vrot.slane %v298_v30, 1 }
 0x10b   :  { %v293_v33 = vadd.f32 %v292_v31, %v291_v28 }
 0x10c   :  { %v300_v35 = vadd.f32 %v299_v32, %v298_v30 }
 0x10d   :  { %403 = vrcp.f32 %v293_v33 }
 0x10e   :  { %405 = vrcp.f32 %v300_v35 }
 0x10f   :  { %407 = vrcp.f32 %v307_v36 }
 0x113   :  { %v402_v37 = vpop.eup %401 }
 0x114   :  { %v309_v38 = vmul.f32 %v402_v37, %v394_v4 }
 0x116   :  { %318 = vperm.xlu0 %391, %v309_v38  }
 0x117   :  { %v404_v39 = vpop.eup %403 }
 0x118   :  { %v311_v40 = vmul.f32 %v404_v39, %v398_v11  ;;  %v406_v41 = vpop.eup %405 }
 0x119   :  { %v313_v42 = vmul.f32 %v406_v41, %v400_v13  ;;  %v408_v43 = vpop.eup %407 }
 0x11a   :  { %323 = vperm.xlu1 %392, %v311_v40   ;;  %v315_v44 = vmul.f32 %v408_v43, %v396_v5 }
 0x11e   :  { %328 = vperm.xlu1 %392, %v313_v42  }
 0x122   :  { %333 = vperm.xlu1 %392, %v315_v44  }
 0x195   :  { %v319_v45 = vpop.permute.xlu0 %318 }
 0x196   :  { %v336_v46 = vmul.f32 %v319_v45, %v581_v1 }
 0x198   :  { %v340_v47 = vadd.f32 %v336_v46, %v581_v1 }
 0x199   :  { %v324_v48 = vpop.permute.xlu1 %323 }
 0x19a   :  { %344 = vst.msk [vmem:[#allocation9] sm:$0xff] %vm215_vm1, %v340_v47  ;;  %v337_v49 = vmul.f32 %v324_v48, %v576_v61 }
 0x19c   :  { %v341_v50 = vadd.f32 %v337_v49, %v576_v61 }
 0x19d   :  { %v329_v51 = vpop.permute.xlu1 %328 }
 0x19e   :  { %345 = vst.msk [vmem:[#allocation9 + $0x8] sm:$0xff] %vm215_vm1, %v341_v50  ;;  %v338_v52 = vmul.f32 %v329_v51, %v590_v6 }
 0x1a0   :  { %v342_v53 = vadd.f32 %v338_v52, %v590_v6 }
 0x1a1   :  { %v334_v54 = vpop.permute.xlu1 %333 }
 0x1a2   :  { %346 = vst.msk [vmem:[#allocation9 + $0x10] sm:$0xff] %vm215_vm1, %v342_v53  ;;  %v339_v1 = vmul.f32 %v334_v54, %v584_v3 }
 0x1a4   :  { %v343_v55 = vadd.f32 %v339_v1, %v584_v3 }
 0x1a6   :  { %347 = vst.msk [vmem:[#allocation9 + $0x18] sm:$0xff] %vm215_vm1, %v343_v55 }
 0x1a7   :  { %486 = shalt.err (!%p483_p0)
}
 0x1a8   :  { %s487_s27 = scalar_lea.hbm %s636_s3, 512 }
 0x1a9   :  { %p488_p1 = scmp.ne.s32.totalorder %s636_s3, %s487_s27  ;;  %p491_p2 = scmp.lt.u32.totalorder %s487_s27, %s636_s3 }
 0x1ab   :  { %p493_p3 = pnand %p491_p2, %p488_p1 }
 0x1ad   :  { %496 = shalt.err (!%p493_p3)
}
 0x1ae   :  { %359 = dma.vmem_to_hbm [thread:$0]  %s354_s23, 512, %s636_s3, [#allocation5], %s507_s1, %s507_s1, %s508_s9  }
 0x1af   :  { %501 = dma.done.wait [#allocation5], 512  }
 0x1b0   :  { %502 = vsyncadd [#allocation5], 4294966784 }
 0x1b1   :  { %363 = vsyncpa [#allocation4], 1 }
 0x1b2   :  { %364 = vsyncpa [#allocation7], 1 }
 0x1b3   :  { %365 = vsyncpa [#allocation5], 1 }

</bundles_post_ra>
